<compile_context>
chip_gen: v7x
topology: tpu7x:2x2x1
jax: 0.10.0
libtpu: 0.0.40
codegen_flags: <defaults>
</compile_context>

<pallas_src>
import functools
import math

import jax
import jax.numpy as jnp
from jax import lax
from jax.experimental import pallas as pl
from jax.experimental.pallas import tpu as pltpu

_INV_SQRT2 = 1.0 / math.sqrt(2.0)


def _round_up(x, m):
    return (x + m - 1) // m * m


def _pick_chunk(total, target=1024):
    """Largest power-of-two multiple of 128 that divides `total` and is
    <= target; falls back to `total` itself (no chunking)."""
    for c in (1024, 512, 256, 128):
        if c <= min(total, target) and total % c == 0:
            return c
    return total


def _vmem_budget_bytes():
    """Per-generation VMEM cap: ~3/4 of physical capacity (leaves headroom for
    Mosaic internal scratch / semaphores). ≈48 MiB on v7x, ≈96 MiB on v5e/v6e."""
    try:
        cap = int(pltpu.get_tpu_info().vmem_capacity_bytes)
    except Exception:
        cap = 64 << 20
    return (cap * 3) // 4


def _mlp_kernel(x_ref, w1_ref, b1_ref, w2_ref, b2_ref, o_ref, acc_ref,
                *, dsub, nsub):
    """One (tm, C) row tile x one (dk) hidden-dim block.

    Grid = (row_tiles, D // dk). The output block index is constant along the
    reduction axis (axis 1), so acc_ref carries fc2 partial sums across it.
    """
    k = pl.program_id(1)

    @pl.when(k == 0)
    def _init():
        acc_ref[...] = jnp.zeros_like(acc_ref)

    # Fused input cast (no separate HBM cast pass in the wrapper).
    x = x_ref[...].astype(w1_ref.dtype)

    if nsub == 1:
        # fc1 (MXU, f32 accumulate) + bias -> exact erf-GELU -> fc2 partial.
        h = jnp.dot(x, w1_ref[...], preferred_element_type=jnp.float32)
        h = h + b1_ref[...]
        h = 0.5 * h * (1.0 + lax.erf(h * _INV_SQRT2))
        acc_ref[...] += jnp.dot(h.astype(w2_ref.dtype), w2_ref[...],
                                preferred_element_type=jnp.float32)
    else:
        # Chunk the hidden dimension: shrinks the f32 hidden temporary to
        # (tm, dsub) and interleaves GELU VALU work with MXU streaming.
        def body(c, carry):
            off = pl.multiple_of(c * dsub, dsub)
            h = jnp.dot(x, w1_ref[:, pl.ds(off, dsub)],
                        preferred_element_type=jnp.float32)
            h = h + b1_ref[:, pl.ds(off, dsub)]
            h = 0.5 * h * (1.0 + lax.erf(h * _INV_SQRT2))
            acc_ref[...] += jnp.dot(h.astype(w2_ref.dtype),
                                    w2_ref[pl.ds(off, dsub), :],
                                    preferred_element_type=jnp.float32)
            return carry

        lax.fori_loop(0, nsub, body, 0, unroll=True)

    @pl.when(k == pl.num_programs(1) - 1)
    def _finalize():
        # dropout: identity in eval mode.
        o_ref[...] = (acc_ref[...] + b2_ref[...]).astype(o_ref.dtype)


def prepare_mlp_params(w1, b1, w2, b2, compute_dtype=jnp.bfloat16):
    """Cast/reshape parameters ONCE (at init / checkpoint-load time).

    Avoids per-forward-call HBM passes for dtype conversion. Weights are
    stored in the matmul compute dtype; biases stay f32 (added after the f32
    MXU accumulation)."""
    return (w1.astype(compute_dtype),
            b1.reshape(1, -1).astype(jnp.float32),
            w2.astype(compute_dtype),
            b2.reshape(1, -1).astype(jnp.float32))


def mlp_forward(x, params, *, tm_max=256, min_row_steps=4,
                dk_override=None, dsub_override=None):
    """x: (B, N, C) in its natural dtype. params: output of prepare_mlp_params.

    Equivalent to Mlp.forward with mask=None in eval mode:
        fc2(gelu(fc1(x))).
    """
    w1, b1, w2, b2 = params
    B, N, C = x.shape
    D = w1.shape[1]
    M = B * N
    out_dtype = x.dtype

    cbytes = jnp.dtype(w1.dtype).itemsize
    xbytes = jnp.dtype(x.dtype).itemsize
    obytes = jnp.dtype(out_dtype).itemsize

    # Row tile: sublane-aligned, capped, and small enough that small batches
    # still produce >= min_row_steps grid steps (keeps both v7x TCs busy).
    tm = max(8, min(tm_max, _round_up(pl.cdiv(M, min_row_steps), 8)))

    budget = _vmem_budget_bytes()

    def footprint(dk_, dsub_):
        # Double-buffered weight/bias blocks + double-buffered x/out tiles
        # + f32 accumulator + f32/bf16 hidden chunk + slack for Mosaic scratch.
        wmem = 2 * (2 * C * dk_) * cbytes + 2 * (dk_ + C) * 4
        amem = 2 * tm * C * (xbytes + obytes) + tm * C * 4
        hmem = tm * dsub_ * (4 + cbytes)
        return wmem + amem + hmem + (4 << 20)

    # Prefer fully resident weights (constant index_map -> fetched once).
    # Tile the hidden dim across the grid only when they don't fit the budget.
    if dk_override is not None:
        dk = int(dk_override)
    else:
        dk = D
        if D % 128 == 0 and footprint(D, _pick_chunk(D)) > budget:
            dk = 128  # best effort if nothing below fits
            for cand in range(D - 128, 127, -128):
                if D % cand == 0 and footprint(cand, _pick_chunk(cand)) <= budget:
                    dk = cand
                    break

    dsub = int(dsub_override) if dsub_override is not None else _pick_chunk(dk)
    assert D % dk == 0 and dk % dsub == 0, (D, dk, dsub)
    K = D // dk
    nsub = dk // dsub

    vmem_limit = int(min(budget, max(footprint(dk, dsub), 32 << 20)))

    grid = (pl.cdiv(M, tm), K)
    kernel = functools.partial(_mlp_kernel, dsub=dsub, nsub=nsub)

    x2 = x.reshape(M, C)  # collapsing leading dims: free, no HBM pass

    out = pl.pallas_call(
        kernel,
        out_shape=jax.ShapeDtypeStruct((M, C), out_dtype),
        grid_spec=pltpu.PrefetchScalarGridSpec(
            num_scalar_prefetch=0,
            grid=grid,
            in_specs=[
                pl.BlockSpec((tm, C), lambda i, k: (i, 0)),   # x rows (resident over k)
                pl.BlockSpec((C, dk), lambda i, k: (0, k)),   # W1 column block
                pl.BlockSpec((1, dk), lambda i, k: (0, k)),   # b1 block
                pl.BlockSpec((dk, C), lambda i, k: (k, 0)),   # W2 row block
                pl.BlockSpec((1, C), lambda i, k: (0, 0)),    # b2 (resident)
            ],
            out_specs=pl.BlockSpec((tm, C), lambda i, k: (i, 0)),
            scratch_shapes=[pltpu.VMEM((tm, C), jnp.float32)],
        ),
        compiler_params=pltpu.CompilerParams(
            dimension_semantics=("parallel", "arbitrary"),
            vmem_limit_bytes=vmem_limit,
        ),
    )(x2, w1, b1, w2, b2)
    return out.reshape(B, N, C)


def init_params(key, hidden_size, mlp_dim):
    """Deterministic init mirroring Mlp._init_weights:
    xavier_uniform_ for weights, normal(std=1e-6) for biases."""
    k1, k2, k3, k4 = jax.random.split(key, 4)
    bound1 = math.sqrt(6.0 / (hidden_size + mlp_dim))
    bound2 = math.sqrt(6.0 / (mlp_dim + hidden_size))
    w1 = jax.random.uniform(k1, (hidden_size, mlp_dim), jnp.float32,
                            minval=-bound1, maxval=bound1)
    w2 = jax.random.uniform(k2, (mlp_dim, hidden_size), jnp.float32,
                            minval=-bound2, maxval=bound2)
    b1 = 1e-6 * jax.random.normal(k3, (mlp_dim,), jnp.float32)
    b2 = 1e-6 * jax.random.normal(k4, (hidden_size,), jnp.float32)
    return w1, b1, w2, b2


def mlp_reference(x, w1, b1, w2, b2):
    h = jnp.dot(x, w1) + b1
    h = 0.5 * h * (1.0 + lax.erf(h * _INV_SQRT2))
    return jnp.dot(h, w2) + b2


if __name__ == "__main__":
    # Small shapes consistent with the module: batch=2, seq=8, hidden=32, mlp_dim=64.
    B, N, C, D = 2, 8, 32, 64
    key = jax.random.PRNGKey(0)
    kx, kp = jax.random.split(key)
    x = jax.random.normal(kx, (B, N, C), jnp.float32)
    w1, b1, w2, b2 = init_params(kp, C, D)
    ref = mlp_reference(x, w1, b1, w2, b2)

    # Exact f32 path (matches torch erf-GELU semantics to fp roundoff).
    p_f32 = prepare_mlp_params(w1, b1, w2, b2, compute_dtype=jnp.float32)
    out_f32 = jax.block_until_ready(mlp_forward(x, p_f32))
    assert out_f32.shape == (B, N, C)
    assert jnp.allclose(out_f32, ref, atol=1e-5, rtol=1e-5), "f32 mismatch"

    # Default fast path: bf16 matmul operands, f32 MXU accumulation.
    p_bf16 = prepare_mlp_params(w1, b1, w2, b2)
    out_bf16 = jax.block_until_ready(mlp_forward(x, p_bf16))
    assert out_bf16.shape == (B, N, C)
    assert jnp.allclose(out_bf16, ref, atol=3e-2, rtol=3e-2), "bf16 mismatch"

    # Non-multiple token count (exercises the ragged trailing row block,
    # e.g. 197-token ViT sequences) -- no host-side pad/slice anymore.
    Np = 7
    xp = jax.random.normal(jax.random.PRNGKey(1), (B, Np, C), jnp.float32)
    refp = mlp_reference(xp, w1, b1, w2, b2)
    outp = jax.block_until_ready(mlp_forward(xp, p_f32))
    assert outp.shape == (B, Np, C)
    assert jnp.allclose(outp, refp, atol=1e-5, rtol=1e-5), "ragged-row mismatch"

    # Exercise the D-tiled reduction path (grid K=2 with f32 accumulator) and
    # the in-kernel hidden-dim chunk loop (nsub=2) at small scale.
    D2 = 256
    w1b, b1b, w2b, b2b = init_params(jax.random.PRNGKey(2), C, D2)
    refb = mlp_reference(x, w1b, b1b, w2b, b2b)
    p2 = prepare_mlp_params(w1b, b1b, w2b, b2b, compute_dtype=jnp.float32)
    out_k2 = jax.block_until_ready(mlp_forward(x, p2, dk_override=128))
    assert jnp.allclose(out_k2, refb, atol=1e-5, rtol=1e-5), "D-tiled mismatch"
    out_ns2 = jax.block_until_ready(mlp_forward(x, p2, dsub_override=128))
    assert jnp.allclose(out_ns2, refb, atol=1e-5, rtol=1e-5), "chunked mismatch"

    # TODO(synk): the optional `mask` argument (in-place overwrite of hidden
    # channels), the stateful self.act/self.val clones, and the rest of
    # VisionTransformer (patch-embed conv, multi-head attention, layernorms,
    # encoder stacking, pred head, train-mode dropout) are not modeled here;
    # only the standard Mlp mask=None eval forward is implemented as a fused
    # Pallas kernel.
    print("KERNEL_OK")
</pallas_src>

<mosaic_0001>
module attributes {stable_mosaic.version = 11 : i64} {
  func.func @_mlp_kernel(%arg0: i32, %arg1: i32, %arg2: memref<8x32xf32, #tpu.memory_space<vmem>>, %arg3: memref<32x64xf32, #tpu.memory_space<vmem>>, %arg4: memref<1x64xf32, #tpu.memory_space<vmem>>, %arg5: memref<64x32xf32, #tpu.memory_space<vmem>>, %arg6: memref<1x32xf32, #tpu.memory_space<vmem>>, %arg7: memref<8x32xf32, #tpu.memory_space<vmem>>, %arg8: memref<8x32xf32, #tpu.memory_space<vmem>>) attributes {dimension_semantics = [#tpu.dimension_semantics<parallel>, #tpu.dimension_semantics<arbitrary>], iteration_bounds = array<i64: 2, 1>, scalar_prefetch = 0 : i64, scratch_operands = 1 : i64, tpu.core_type = #tpu.core_type<tc>, window_params = [{transform_indices = @transform_0, window_bounds = array<i64: 8, 32>}, {transform_indices = @transform_1, window_bounds = array<i64: 32, 64>}, {transform_indices = @transform_2, window_bounds = array<i64: 1, 64>}, {transform_indices = @transform_3, window_bounds = array<i64: 64, 32>}, {pipeline_mode = #tpu.pipeline_mode<synchronous>, transform_indices = @transform_4, window_bounds = array<i64: 1, 32>}, {transform_indices = @transform_5, window_bounds = array<i64: 8, 32>}]} {
    %c0_i32 = arith.constant 0 : i32
    %0 = arith.cmpi eq, %arg1, %c0_i32 : i32
    %1 = arith.extui %0 : i1 to i32
    %c0_i32_0 = arith.constant 0 : i32
    %2 = arith.cmpi ne, %1, %c0_i32_0 : i32
    scf.if %2 {
      %cst_18 = arith.constant 0.000000e+00 : f32
      %25 = vector.broadcast %cst_18 : f32 to vector<8x32xf32>
      %c0_19 = arith.constant 0 : index
      %c0_20 = arith.constant 0 : index
      %26 = vector.load %arg8[%c0_19, %c0_20] : memref<8x32xf32, #tpu.memory_space<vmem>>, vector<8x32xf32>
      tpu.vector_store %arg8[%c0_19, %c0_20], %25 {strides = array<i32>} : memref<8x32xf32, #tpu.memory_space<vmem>>, vector<8x32xf32>,
    } else {
    }
    %c0 = arith.constant 0 : index
    %c0_1 = arith.constant 0 : index
    %3 = vector.load %arg2[%c0, %c0_1] : memref<8x32xf32, #tpu.memory_space<vmem>>, vector<8x32xf32>
    %c0_2 = arith.constant 0 : index
    %c0_3 = arith.constant 0 : index
    %4 = vector.load %arg3[%c0_2, %c0_3] : memref<32x64xf32, #tpu.memory_space<vmem>>, vector<32x64xf32>
    %cst = arith.constant dense<0.000000e+00> : vector<8x64xf32>
    %5 = tpu.matmul %3, %4, %cst {dimension_numbers = #tpu.dot_dimension_numbers<[1], [0], [0], [1], [0, 0, 1, 1], [], []>} : vector<8x32xf32>, vector<32x64xf32>, vector<8x64xf32> -> vector<8x64xf32>
    %c0_4 = arith.constant 0 : index
    %c0_5 = arith.constant 0 : index
    %6 = vector.load %arg4[%c0_4, %c0_5] : memref<1x64xf32, #tpu.memory_space<vmem>>, vector<1x64xf32>
    %7 = vector.broadcast %6 : vector<1x64xf32> to vector<8x64xf32>
    %8 = arith.addf %5, %7 : vector<8x64xf32>
    %cst_6 = arith.constant 5.000000e-01 : f32
    %9 = vector.broadcast %cst_6 : f32 to vector<8x64xf32>
    %10 = arith.mulf %9, %8 : vector<8x64xf32>
    %cst_7 = arith.constant 0.707106769 : f32
    %11 = vector.broadcast %cst_7 : f32 to vector<8x64xf32>
    %12 = arith.mulf %8, %11 : vector<8x64xf32>
    %13 = math.erf %12 : vector<8x64xf32>
    %cst_8 = arith.constant 1.000000e+00 : f32
    %14 = vector.broadcast %cst_8 : f32 to vector<8x64xf32>
    %15 = arith.addf %14, %13 : vector<8x64xf32>
    %16 = arith.mulf %10, %15 : vector<8x64xf32>
    %c0_9 = arith.constant 0 : index
    %c0_10 = arith.constant 0 : index
    %17 = vector.load %arg8[%c0_9, %c0_10] : memref<8x32xf32, #tpu.memory_space<vmem>>, vector<8x32xf32>
    %c0_11 = arith.constant 0 : index
    %c0_12 = arith.constant 0 : index
    %18 = vector.load %arg5[%c0_11, %c0_12] : memref<64x32xf32, #tpu.memory_space<vmem>>, vector<64x32xf32>
    %cst_13 = arith.constant dense<0.000000e+00> : vector<8x32xf32>
    %19 = tpu.matmul %16, %18, %cst_13 {dimension_numbers = #tpu.dot_dimension_numbers<[1], [0], [0], [1], [0, 0, 1, 1], [], []>} : vector<8x64xf32>, vector<64x32xf32>, vector<8x32xf32> -> vector<8x32xf32>
    %20 = arith.addf %17, %19 : vector<8x32xf32>
    %c0_14 = arith.constant 0 : index
    %c0_15 = arith.constant 0 : index
    %21 = vector.load %arg8[%c0_14, %c0_15] : memref<8x32xf32, #tpu.memory_space<vmem>>, vector<8x32xf32>
    tpu.vector_store %arg8[%c0_14, %c0_15], %20 {strides = array<i32>} : memref<8x32xf32, #tpu.memory_space<vmem>>, vector<8x32xf32>,
    %c0_i32_16 = arith.constant 0 : i32
    %22 = arith.cmpi eq, %arg1, %c0_i32_16 : i32
    %23 = arith.extui %22 : i1 to i32
    %c0_i32_17 = arith.constant 0 : i32
    %24 = arith.cmpi ne, %23, %c0_i32_17 : i32
    scf.if %24 {
      %c0_18 = arith.constant 0 : index
      %c0_19 = arith.constant 0 : index
      %25 = vector.load %arg8[%c0_18, %c0_19] : memref<8x32xf32, #tpu.memory_space<vmem>>, vector<8x32xf32>
      %c0_20 = arith.constant 0 : index
      %c0_21 = arith.constant 0 : index
      %26 = vector.load %arg6[%c0_20, %c0_21] : memref<1x32xf32, #tpu.memory_space<vmem>>, vector<1x32xf32>
      %27 = vector.broadcast %26 : vector<1x32xf32> to vector<8x32xf32>
      %28 = arith.addf %25, %27 : vector<8x32xf32>
      %c0_22 = arith.constant 0 : index
      %c0_23 = arith.constant 0 : index
      %29 = vector.load %arg7[%c0_22, %c0_23] : memref<8x32xf32, #tpu.memory_space<vmem>>, vector<8x32xf32>
      tpu.vector_store %arg7[%c0_22, %c0_23], %28 {strides = array<i32>} : memref<8x32xf32, #tpu.memory_space<vmem>>, vector<8x32xf32>,
    } else {
    }
    return
  }
  func.func @transform_0(%arg0: i32, %arg1: i32) -> (i32, i32) {
    %c0_i32 = arith.constant 0 : i32
    %c0_i32_0 = arith.constant 0 : i32
    return %arg0, %c0_i32 : i32, i32
  }
  func.func @transform_1(%arg0: i32, %arg1: i32) -> (i32, i32) {
    %c0_i32 = arith.constant 0 : i32
    %c0_i32_0 = arith.constant 0 : i32
    return %c0_i32, %arg1 : i32, i32
  }
  func.func @transform_2(%arg0: i32, %arg1: i32) -> (i32, i32) {
    %c0_i32 = arith.constant 0 : i32
    %c0_i32_0 = arith.constant 0 : i32
    return %c0_i32, %arg1 : i32, i32
  }
  func.func @transform_3(%arg0: i32, %arg1: i32) -> (i32, i32) {
    %c0_i32 = arith.constant 0 : i32
    %c0_i32_0 = arith.constant 0 : i32
    return %arg1, %c0_i32 : i32, i32
  }
  func.func @transform_4(%arg0: i32, %arg1: i32) -> (i32, i32) {
    %c0_i32 = arith.constant 0 : i32
    %c0_i32_0 = arith.constant 0 : i32
    %c0_i32_1 = arith.constant 0 : i32
    return %c0_i32, %c0_i32_0 : i32, i32
  }
  func.func @transform_5(%arg0: i32, %arg1: i32) -> (i32, i32) {
    %c0_i32 = arith.constant 0 : i32
    %c0_i32_0 = arith.constant 0 : i32
    return %arg0, %c0_i32 : i32, i32
  }
}

</mosaic_0001>

<bundles_post_ra>
// kernel: tpu_custom_call.1
= control target key start
LH: loop header
LB: loop body
LE: loop exit
PB: predicated region body
PF: predicated region fallthrough
CT: control target
= control target key end

     0   :  { %10 = vsyncpa [#allocation4], 0  ;;  %s1015_s0 = inlined_call_operand.vmem [shape: f32[16,32], index: 0, kind: input, shape index: {}]   ;;  %s1016_s1 = inlined_call_operand.vmem [shape: f32[32,64], index: 1, kind: input, shape index: {}]   ;;  %s1017_s2 = inlined_call_operand.vmem [shape: f32[1,64], index: 2, kind: input, shape index: {}]   ;;  %s1018_s3 = inlined_call_operand.vmem [shape: f32[64,32], index: 3, kind: input, shape index: {}]   ;;  %s1019_s4 = inlined_call_operand.vmem [shape: f32[1,32], index: 4, kind: input, shape index: {}]   ;;  %s1020_s5 = inlined_call_operand.hbm [shape: f32[16,32], index: 5, kind: output, shape index: {}]  }
   0x1   :  { %12 = vsyncpa [#allocation4 + $0x1], 0  ;;  %s857_s18 = smov 0   ;;  %s859_s19 = smov 0  }
   0x2   :  { %s861_s20 = smov 0   ;;  %s863_s21 = smov 0  }
   0x3   :  { %s865_s22 = smov 0   ;;  %s867_s23 = smov 0  }
   0x4 LB: > { %s603_s24 = sadd.s32 4294967295, %s821_s23   ;;  %s604_s25 = sadd.s32 4294967294, %s821_s23   ;;  %s821_s23 = sphi %s867_s23, %s18_s23   ;;  %s817_s22 = sphi %s865_s22, %s1027_s22   ;;  %s813_s21 = sphi %s863_s21, %s1026_s21   ;;  %s809_s20 = sphi %s861_s20, %s1025_s20   ;;  %s805_s19 = sphi %s859_s19, %s1024_s19   ;;  %s801_s18 = sphi %s857_s18, %s1023_s18  }
   0x5   : > { %s30_s26 = sadd.s32 1, %s817_s22  ;;  %s162_s27 = sadd.s32 1, %s809_s20 }
   0x6   : > { %p32_p0 = scmp.ge.s32.totalorder %s30_s26, 2  ;;  %p172_p1 = scmp.ne.s32.totalorder %s809_s20, %s805_s19 }
   0x7   : > { %p173_p2 = scmp.eq.s32.totalorder %s603_s24, 1  ;;  %p178_p3 = scmp.ne.s32.totalorder %s805_s19, %s801_s18 }
   0x8   : > { %s1029_s26 = smov (%p32_p0, %s30_s26), 0  ;;  %p179_p5 = scmp.eq.s32.totalorder %s604_s25, 1 }
   0x9   : > { %p897_p4 = por %p173_p2, %p172_p1  ;;  %s159_s29 = ssub.s32 %s817_s22, %s1029_s26 }
   0xa   : > { %p610_p6 = scmp.ge.s32.totalorder %s821_s23, 1  ;;  %p160_p7 = scmp.eq.s32.totalorder %s159_s29, 0 }
   0xb   : > { %p904_p8 = por %p179_p5, %p178_p3  ;;  %p229_p9 = scmp.lt.s32.totalorder %s821_s23, 3 }
   0xc   : > { %s910_s6 = scalar_select %p160_p7, %s809_s20, %s162_s27  }
   0xd   : > { %p230_p10 = pnand %p610_p6, %p229_p9 }
   0xe   : > { %v292_v0 = vld [vmem:[%s1016_s1] sm:$0xff] (!%p230_p10)  ;;  %v293_v1 = vld [vmem:[%s1016_s1 + $0x8] sm:$0xff] (!%p230_p10)  ;;  %v294_v2 = vld [vmem:[%s1016_s1 + $0x10] sm:$0xff] (!%p230_p10)  ;;  %v823_v3 = vmov (!%p230_p10), 0.0|0.0   ;;  %vm824_vm0 = vmmov (!%p230_p10), 0   ;;  %v825_v6 = vmov (!%p230_p10), 0.0  }
   0xf   : > { %233 = sbr.rel (%p230_p10) target bundleno = 496 (0x1f0), region = 40  ;;  %665 = vmatprep.subr.bf16.mxu0 (!%p230_p10), %v823_v3  ;;  %v666_v4 = vpack.c.bf16 (!%p230_p10), %v293_v1, %v292_v0  ;;  %v295_v5 = vld [vmem:[%s1016_s1 + $0x18] sm:$0xff] (!%p230_p10)  ;;  %643 = vmatprep.mubr.msk.f32.mxu0 (!%p230_p10), %vm824_vm0, %v825_v6  ;;  %p268_p11 = scmp.lt.s32.totalorder (!%p230_p10), %s813_s21, 1  ;;  %vm289_vm1 = vcmask (!%p230_p10), 261120   ;;  %v383_v9 = vld [vmem:[%s1018_s3] sm:$0xff] (!%p230_p10)  ;;  %v384_v10 = vld [vmem:[%s1018_s3 + $0x8] sm:$0xff] (!%p230_p10) }
  0x10   : > { %290 = vst.msk [vmem:[#allocation2] sm:$0xff] (!%p230_p10), %vm289_vm1, %v825_v6  ;;  %671 = vmatprep.subr.bf16.mxu1 (!%p230_p10), %v823_v3  ;;  %662 = vmatprep.mubr.msk.f32.mxu1 (!%p230_p10), %vm824_vm0, %v825_v6  ;;  %v669_v7 = vpack.c.bf16 (!%p230_p10), %v295_v5, %v294_v2  ;;  %v672_v11 = vpack.c.bf16 (!%p230_p10), %v384_v10, %v383_v9  ;;  %v385_v12 = vld [vmem:[%s1018_s3 + $0x10] sm:$0xff] (!%p230_p10)  ;;  %v386_v13 = vld [vmem:[%s1018_s3 + $0x18] sm:$0xff] (!%p230_p10)  ;;  %v387_v15 = vld [vmem:[%s1018_s3 + $0x20] sm:$0xff] (!%p230_p10)  ;;  %vm391_vm2 = vcmask (!%p230_p10), 523264   ;;  %s265_s8 = sand.u32 (!%p230_p10), 1, %s805_s19  }
  0x11   : > { %667 = vmatpush3.bf16.msra.mxu0 (!%p230_p10), %v666_v4  ;;  %v675_v14 = vpack.c.bf16 (!%p230_p10), %v386_v13, %v385_v12  ;;  %v388_v16 = vld [vmem:[%s1018_s3 + $0x28] sm:$0xff] (!%p230_p10)  ;;  %v389_v18 = vld [vmem:[%s1018_s3 + $0x30] sm:$0xff] (!%p230_p10)  ;;  %v390_v19 = vld [vmem:[%s1018_s3 + $0x38] sm:$0xff] (!%p230_p10)  ;;  %s611_s9 = sshll.u32 (!%p230_p10), %s265_s8, 3  ;;  %s618_s12 = sshll.u32 (!%p230_p10), %s813_s21, 7 }
  0x12   : > { %668 = vmatprep.subr.bf16.mxu0 (!%p230_p10), %v823_v3  ;;  %673 = vmatpush3.bf16.msra.mxu1 (!%p230_p10), %v672_v11  ;;  %v678_v17 = vpack.c.bf16 (!%p230_p10), %v388_v16, %v387_v15  ;;  %v681_v20 = vpack.c.bf16 (!%p230_p10), %v390_v19, %v389_v18  ;;  %v613_v21 = vld [vmem:[%s1017_s2] ss:$0 sm:$0xff] (!%p230_p10)  ;;  %s267_s13 = scalar_lea.vmem (!%p230_p10), [#allocation3], %s611_s9  ;;  %s967_s17 = scalar_lea.hbm (!%p230_p10), %s1020_s5, %s618_s12 }
  0x13   : > { %674 = vmatprep.subr.bf16.mxu1 (!%p230_p10), %v823_v3  ;;  %v616_v34 = vld [vmem:[%s1019_s4] ss:$0 sm:$0xff] (!%p230_p10)  ;;  %s494_s14 = sshll.u32 (!%p230_p10), %s267_s13, 4  ;;  %s481_s24 = scalar_lea.sflag (!%p230_p10), [#allocation4], %s265_s8  ;;  %s969_s14 = int_to_ptr.vmem [resolvable:$true] %s494_s14 }
  0x15   : > { %670 = vmatpush3.bf16.msra.mxu0 (!%p230_p10), %v669_v7 }
  0x16   : > { %s269_s15 = scalar_select %p268_p11, %s813_s21, 1  ;;  %676 = vmatpush3.bf16.msra.mxu1 %v675_v14 }
  0x17   : > { %677 = vmatprep.subr.bf16.mxu1 %v823_v3  ;;  %v382_v30 = vld [vmem:[#allocation2] sm:$0xff]  ;;  %s826_s21 = smov [#allocation3]  }
  0x18   : > { %s612_s16 = sshll.u32 %s269_s15, 3  ;;  %s747_s27 = sshll.u32 %s826_s21, 4  ;;  %s748_s27 = int_to_ptr.vmem [resolvable:$false] %s747_s27 }
  0x19   : > { %s271_s25 = scalar_lea.vmem %s1015_s0, %s612_s16  ;;  %s749_s29 = scalar_lea.vmem %s748_s27, 256 }
  0x1a   : > { %v291_v8 = vld [vmem:[%s271_s25] sm:$0xff]  ;;  %679 = vmatpush3.bf16.msra.mxu1 %v678_v17  ;;  %s743_s25 = scalar_lea.vmem %s969_s14, 128  ;;  %p750_p1 = scmp.lt.s32.totalorder %s969_s14, %s748_s27 }
  0x1b   : > { %644 = vmatmul.mubr.msk.f32.vlgmr.msra.gmra.mrb[0].mxu0 %vm289_vm1, %v291_v8  ;;  %680 = vmatprep.subr.bf16.mxu1 %v823_v3  ;;  %p744_p12 = scmp.ne.s32.totalorder %s969_s14, %s743_s25  ;;  %p751_p2 = scmp.lt.s32.totalorder %s749_s29, %s743_s25 }
  0x1d   : > { %p745_p13 = pnand %p744_p12, %p897_p4  ;;  %p752_p3 = por %p751_p2, %p750_p1 }
  0x1e   : > { %682 = vmatpush3.bf16.msra.mxu1 %v681_v20 }
  0x1f   : > { %p746_p0 = pneg %p745_p13 }
  0x21   : > { %p753_p5 = pnand %p752_p3, %p746_p0 }
  0xee   : > { %v373_v22 = vpop.f32.mrb[0].mxu0 }
  0xef   : > { %v374_v23 = vadd.f32 %v613_v21, %v373_v22  ;;  %v645_v24 = vpop.f32.mrb[1].mxu0 }
  0xf1   : > { %v378_v25 = vmul.f32 0.70710677, %v374_v23  ;;  %v377_v27 = vmul.f32 0.5, %v374_v23 }
  0xf3   : > { %741 = verf.f32 %v378_v25 }
  0xfd   : > { %v742_v26 = vpop.eup %741 }
  0xfe   : > { %v380_v28 = vadd.f32 1.0, %v742_v26 }
 0x100   : > { %v381_v29 = vmul.f32 %v380_v28, %v377_v27 }
 0x102   : > { %663 = vmatmul.mubr.msk.f32.vlgmr.msra.gmra.mrb[0].mxu1 %vm391_vm2, %v381_v29 }
 0x1d5   : > { %v461_v31 = vpop.f32.mrb[0].mxu1 }
 0x1d6   : > { %v465_v32 = vadd.f32 %v461_v31, %v382_v30  ;;  %v664_v33 = vpop.f32.mrb[1].mxu1 }
 0x1d8   : > { %466 = vst.msk [vmem:[#allocation2] sm:$0xff] %vm289_vm1, %v465_v32 }
 0x1df   : > { %v470_v35 = vld [vmem:[#allocation2] sm:$0xff] }
 0x1e0   : > { %v478_v36 = vadd.f32 %v616_v34, %v470_v35 }
 0x1e2   : > { %479 = vst.msk [vmem:[%s267_s13] sm:$0xff] %vm289_vm1, %v478_v36 }
 0x1e3   : > { %756 = shalt.err (!%p753_p5)
}
 0x1e4   : > { %s757_s7 = scalar_lea.hbm %s967_s17, 128  ;;  %s761_s10 = scalar_lea.hbm %s1020_s5, 256 }
 0x1e5   : > { %p758_p6 = scmp.ne.s32.totalorder %s967_s17, %s757_s7  ;;  %p762_p10 = scmp.lt.u32.totalorder %s967_s17, %s1020_s5 }
 0x1e6   : > { %p763_p11 = scmp.lt.u32.totalorder %s761_s10, %s757_s7  ;;  %p765_p13 = scmp.lt.u32.totalorder %s757_s7, %s967_s17 }
 0x1e7   : > { %p759_p7 = pnand %p758_p6, %p897_p4 }
 0x1e8   : > { %p764_p12 = por %p763_p11, %p762_p10 }
 0x1e9   : > { %p760_p9 = pneg %p759_p7 }
 0x1ea   : > { %p766_p0 = por %p765_p13, %p764_p12 }
 0x1ec   : > { %p767_p1 = pnand %p766_p0, %p760_p9 }
 0x1ee   : > { %770 = shalt.err (!%p767_p1)
}
 0x1ef   : > { %683 = dma.vmem_to_hbm [thread:$0]  (%p897_p4), %s969_s14, 128, %s967_s17, %s481_s24  }
 0x1f0 PF: > { %p689_p2 = scmp.ge.s32.totalorder %s821_s23, 2  ;;  %s506_s13 = sand.u32 1, %s801_s18  }
 0x1f1   : > { %s507_s15 = scalar_lea.sflag [#allocation4], %s506_s13 }
 0x1f2   : > { %p686_p3 = pnand %p689_p2, %p904_p8 }
 0x1f4   : > { %796 = dma.done.wait (!%p686_p3), %s507_s15, 128  }
 0x1f5   : > { %798 = vsyncadd (!%p686_p3), %s507_s15, 4294967168  ;;  %s18_s23 = sadd.s32 1, %s821_s23   ;;  %s1023_s18 = smov %s805_s19 }
 0x1f6   : > { %p15_p5 = scmp.ge.s32.totalorder %s18_s23, 4   ;;  %s1024_s19 = smov %s809_s20 }
 0x1f7   : > { %s1025_s20 = smov %s910_s6  ;;  %s1026_s21 = smov %s817_s22 }
 0x1f8   : > { %s1027_s22 = smov %s1029_s26  ;;  %17 = sbr.rel (!%p15_p5) target bundleno = 4 (0x4), region = 92 }
 0x1ff   :  { %512 = vsyncpa [#allocation4], 1 }
 0x200   :  { %514 = vsyncpa [#allocation4 + $0x1], 1 }

</bundles_post_ra>
